<compile_context>
chip_gen: v6e
topology: v6e:2x2x1
jax: 0.10.0
libtpu: 0.0.40
codegen_flags: <defaults>
</compile_context>

<pallas_src>
import functools

import jax
import jax.numpy as jnp
from jax.experimental import pallas as pl
from jax.experimental.pallas import tpu as pltpu


def _round_up(x, m):
    return ((x + m - 1) // m) * m


def _cdiv(a, b):
    return -(-a // b)


def _balanced_tile(total, t_max, align):
    """Largest roughly-balanced tile <= t_max (aligned) to avoid over-padding."""
    n_tiles = max(1, _cdiv(total, t_max))
    t = _round_up(_cdiv(total, n_tiles), align)
    return min(t, _round_up(total, align))


def _vmem_capacity_bytes():
    # v5e/v6e: 128 MiB physical VMEM, v7x: 64 MiB.  Fall back to the
    # conservative v7x figure if the query is unavailable.
    try:
        cap = getattr(pltpu.get_tpu_info(), "vmem_capacity_bytes", None)
        if cap:
            return int(cap)
    except Exception:
        pass
    return 64 * 1024 * 1024


def _linear_kernel(x_ref, w_ref, b_ref, o_ref, acc_ref):
    # x_ref: (tm, tk)  w_ref: (tk, tn)  b_ref: (1, tn)  o_ref: (tm, tn)
    # acc_ref: (tm, tn) f32 scratch, persists across the reduction grid axis.
    k = pl.program_id(2)

    @pl.when(k == 0)
    def _():
        acc_ref[...] = jnp.zeros_like(acc_ref)

    # In-kernel cast of x to the MXU operand dtype (x is read exactly here,
    # so this avoids a separate wrapper-side HBM pass over x).
    acc_ref[...] += jnp.dot(
        x_ref[...].astype(w_ref.dtype), w_ref[...],
        preferred_element_type=jnp.float32)

    @pl.when(k == pl.num_programs(2) - 1)
    def _():
        o_ref[...] = (acc_ref[...] + b_ref[...]).astype(o_ref.dtype)


@functools.partial(jax.jit,
                   static_argnames=("compute_dtype", "tm_max", "tn_max", "tk_max"))
def linear_classifier(x, weight, bias, *, compute_dtype=None,
                      tm_max=512, tn_max=512, tk_max=2048):
    """x: (B, D); weight: (C, D) (PyTorch nn.Linear layout); bias: (C,).

    compute_dtype: optional narrower MXU operand dtype (e.g. jnp.bfloat16 —
    native on v5e/v6e/v7x); accumulation stays f32, output keeps x's dtype.
    """
    B, D = x.shape
    C, D2 = weight.shape
    assert D == D2 and bias.shape == (C,)
    out_dtype = x.dtype
    cd = jnp.dtype(compute_dtype) if compute_dtype is not None else jnp.dtype(x.dtype)

    it_x = jnp.dtype(x.dtype).itemsize
    it_w = cd.itemsize
    it_out = jnp.dtype(out_dtype).itemsize

    # Minimal vreg-native padding: sublanes -> 8 (batch), lanes -> 128 (D, C).
    B8 = _round_up(B, 8)
    C128 = _round_up(C, 128)
    D128 = _round_up(D, 128)

    # ---- tile selection: balanced tiles, then shrink to the VMEM budget ----
    vmem_cap = _vmem_capacity_bytes()
    budget = min(vmem_cap * 3 // 4, 100 * 1024 * 1024)   # ~48 MiB v7x, ~96 MiB v5e/v6e

    tm = _balanced_tile(B8, tm_max, 8)
    tn = _balanced_tile(C128, tn_max, 128)
    tk = _balanced_tile(D128, tk_max, 128)

    def footprint(tm_, tn_, tk_):
        # double-buffered x/w/bias/out tiles + single f32 accumulator
        return (2 * (tm_ * tk_ * it_x + tk_ * tn_ * it_w + tn_ * 4
                     + tm_ * tn_ * it_out) + tm_ * tn_ * 4)

    # Shrink the reduction tile first (keeps tm/tn large for MXU efficiency),
    # then batch, then classes.  Never under-provision the VMEM limit.
    while footprint(tm, tn, tk) > budget:
        if tk > 512:
            tk = _round_up(tk // 2, 128)
        elif tm > 256:
            tm = _round_up(tm // 2, 8)
        elif tn > 256:
            tn = _round_up(tn // 2, 128)
        elif tk > 128:
            tk = _round_up(tk // 2, 128)
        elif tm > 8:
            tm = _round_up(tm // 2, 8)
        elif tn > 128:
            tn = _round_up(tn // 2, 128)
        else:
            break   # minimal tiles; footprint is tiny at this point

    B_pad = _round_up(B8, tm)
    C_pad = _round_up(C128, tn)
    D_pad = _round_up(D128, tk)
    gi, gj, gk = B_pad // tm, C_pad // tn, D_pad // tk

    # v7x has 2 TensorCores: when the parallel grid would collapse to a single
    # step, split the batch into >=2 tiles (harmless on single-core chips).
    if gi * gj == 1 and B_pad >= 16:
        tm = max(8, _round_up(tm // 2, 8))
        B_pad = _round_up(B8, tm)
        gi = B_pad // tm

    # ---- wrapper-side operand prep (minimal HBM passes) ----
    # x keeps its dtype (cast happens in-kernel); pad only if misaligned.
    xp = x if (B_pad, D_pad) == (B, D) else jnp.pad(
        x, ((0, B_pad - B), (0, D_pad - D)))
    # Weight: one-time cast + transpose to (D, C) so the kernel runs a plain
    # (tm,tk)x(tk,tn) MXU dot with no per-tile XLU transposes; amortized over
    # every batch tile of every call.
    # TODO(synk): on v7x an fp8 weight path would halve weight HBM traffic.
    wp = weight.astype(cd).T
    if (D_pad, C_pad) != (D, C):
        wp = jnp.pad(wp, ((0, D_pad - D), (0, C_pad - C)))
    # Bias stays f32 (added to the f32 accumulator), lane-padded, 2-D.
    bp = jnp.pad(bias.astype(jnp.float32), (0, C_pad - C)).reshape(1, C_pad)

    # ---- grid ordering: don't re-stream the big operand from HBM ----
    x_bytes = B_pad * D_pad * it_x
    w_bytes = D_pad * C_pad * it_w
    cost_batch_outer = gi * w_bytes + (x_bytes if gk == 1 else gj * x_bytes)
    cost_class_outer = gj * x_bytes + (w_bytes if gk == 1 else gi * w_bytes)
    class_outer = cost_class_outer < cost_batch_outer

    if class_outer:
        grid = (gj, gi, gk)
        x_map = lambda j, i, k: (i, k)
        w_map = lambda j, i, k: (k, j)
        b_map = lambda j, i, k: (0, j)
        o_map = lambda j, i, k: (i, j)
    else:
        grid = (gi, gj, gk)
        x_map = lambda i, j, k: (i, k)
        w_map = lambda i, j, k: (k, j)
        b_map = lambda i, j, k: (0, j)
        o_map = lambda i, j, k: (i, j)

    fp = footprint(tm, tn, tk)
    vmem_limit = max(min(max(fp * 3 // 2, 32 * 1024 * 1024), budget), fp)

    cost = pl.CostEstimate(
        flops=2 * B_pad * D_pad * C_pad,
        transcendentals=0,
        bytes_accessed=x_bytes + w_bytes + B_pad * C_pad * it_out + C_pad * 4)

    out_padded = pl.pallas_call(
        _linear_kernel,
        out_shape=jax.ShapeDtypeStruct((B_pad, C_pad), out_dtype),
        grid_spec=pltpu.PrefetchScalarGridSpec(
            num_scalar_prefetch=0,
            grid=grid,
            in_specs=[
                pl.BlockSpec((tm, tk), x_map),     # x tile
                pl.BlockSpec((tk, tn), w_map),     # weight tile, (D, C) layout
                pl.BlockSpec((1, tn), b_map),      # bias tile
            ],
            out_specs=pl.BlockSpec((tm, tn), o_map),
            scratch_shapes=[pltpu.VMEM((tm, tn), jnp.float32)]),
        compiler_params=pltpu.CompilerParams(
            dimension_semantics=("parallel", "parallel", "arbitrary"),
            vmem_limit_bytes=int(vmem_limit)),
        cost_estimate=cost,
    )(xp, wp, bp)

    return out_padded[:B, :C]


if __name__ == "__main__":
    # Small shapes consistent with the module: input_dim=32, num_classes=10, batch=8.
    batch, input_dim, num_classes = 8, 32, 10

    key = jax.random.PRNGKey(0)
    kx, kw, kb, k2x, k2w, k2b = jax.random.split(key, 6)

    # Deterministic init (mimics nn.Linear's uniform(-1/sqrt(D), 1/sqrt(D))).
    bound = 1.0 / (input_dim ** 0.5)
    weight = jax.random.uniform(kw, (num_classes, input_dim), jnp.float32,
                                minval=-bound, maxval=bound)
    bias = jax.random.uniform(kb, (num_classes,), jnp.float32,
                              minval=-bound, maxval=bound)
    x = jax.random.normal(kx, (batch, input_dim), jnp.float32)

    ref = x @ weight.T + bias

    # f32 path: tight correctness check.
    out = jax.block_until_ready(linear_classifier(x, weight, bias))
    assert out.shape == (batch, num_classes)
    assert jnp.allclose(out, ref, atol=1e-5, rtol=1e-5)

    # bf16-operand / f32-accumulate path (v5e/v6e/v7x): looser check.
    out_bf16 = jax.block_until_ready(
        linear_classifier(x, weight, bias, compute_dtype=jnp.bfloat16))
    assert out_bf16.shape == (batch, num_classes)
    assert jnp.allclose(out_bf16, ref, atol=5e-2, rtol=5e-2)

    # Multi-tile / K-reduction path (forced small tiles): exercises the 3-D
    # grid, accumulator init/finalize, grid ordering and balanced padding.
    b2, d2, c2 = 24, 384, 272
    w2 = jax.random.normal(k2w, (c2, d2), jnp.float32) * 0.05
    bias2 = jax.random.normal(k2b, (c2,), jnp.float32) * 0.05
    x2 = jax.random.normal(k2x, (b2, d2), jnp.float32)
    ref2 = x2 @ w2.T + bias2
    out2 = jax.block_until_ready(
        linear_classifier(x2, w2, bias2, tm_max=16, tn_max=128, tk_max=128))
    assert out2.shape == (b2, c2)
    assert jnp.allclose(out2, ref2, atol=5e-4, rtol=5e-4)

    print("KERNEL_OK")
</pallas_src>

<mosaic_0001>
module attributes {stable_mosaic.version = 11 : i64} {
  func.func @_linear_kernel(%arg0: i32, %arg1: i32, %arg2: i32, %arg3: memref<8x128xf32, #tpu.memory_space<vmem>>, %arg4: memref<128x128xf32, #tpu.memory_space<vmem>>, %arg5: memref<1x128xf32, #tpu.memory_space<vmem>>, %arg6: memref<8x128xf32, #tpu.memory_space<vmem>>, %arg7: memref<8x128xf32, #tpu.memory_space<vmem>>) attributes {dimension_semantics = [#tpu.dimension_semantics<parallel>, #tpu.dimension_semantics<parallel>, #tpu.dimension_semantics<arbitrary>], iteration_bounds = array<i64: 1, 1, 1>, scalar_prefetch = 0 : i64, scratch_operands = 1 : i64, tpu.core_type = #tpu.core_type<tc>, window_params = [{transform_indices = @transform_0, window_bounds = array<i64: 8, 128>}, {transform_indices = @transform_1, window_bounds = array<i64: 128, 128>}, {transform_indices = @transform_2, window_bounds = array<i64: 1, 128>}, {transform_indices = @transform_3, window_bounds = array<i64: 8, 128>}]} {
    %c0_i32 = arith.constant 0 : i32
    %0 = arith.cmpi eq, %arg2, %c0_i32 : i32
    %1 = arith.extui %0 : i1 to i32
    %c0_i32_0 = arith.constant 0 : i32
    %2 = arith.cmpi ne, %1, %c0_i32_0 : i32
    scf.if %2 {
      %cst_10 = arith.constant 0.000000e+00 : f32
      %12 = vector.broadcast %cst_10 : f32 to vector<8x128xf32>
      %c0_11 = arith.constant 0 : index
      %c0_12 = arith.constant 0 : index
      %13 = vector.load %arg7[%c0_11, %c0_12] : memref<8x128xf32, #tpu.memory_space<vmem>>, vector<8x128xf32>
      tpu.vector_store %arg7[%c0_11, %c0_12], %12 {strides = array<i32>} : memref<8x128xf32, #tpu.memory_space<vmem>>, vector<8x128xf32>,
    } else {
    }
    %c0 = arith.constant 0 : index
    %c0_1 = arith.constant 0 : index
    %3 = vector.load %arg7[%c0, %c0_1] : memref<8x128xf32, #tpu.memory_space<vmem>>, vector<8x128xf32>
    %c0_2 = arith.constant 0 : index
    %c0_3 = arith.constant 0 : index
    %4 = vector.load %arg3[%c0_2, %c0_3] : memref<8x128xf32, #tpu.memory_space<vmem>>, vector<8x128xf32>
    %c0_4 = arith.constant 0 : index
    %c0_5 = arith.constant 0 : index
    %5 = vector.load %arg4[%c0_4, %c0_5] : memref<128x128xf32, #tpu.memory_space<vmem>>, vector<128x128xf32>
    %cst = arith.constant dense<0.000000e+00> : vector<8x128xf32>
    %6 = tpu.matmul %4, %5, %cst {dimension_numbers = #tpu.dot_dimension_numbers<[1], [0], [0], [1], [0, 0, 1, 1], [], []>} : vector<8x128xf32>, vector<128x128xf32>, vector<8x128xf32> -> vector<8x128xf32>
    %7 = arith.addf %3, %6 : vector<8x128xf32>
    %c0_6 = arith.constant 0 : index
    %c0_7 = arith.constant 0 : index
    %8 = vector.load %arg7[%c0_6, %c0_7] : memref<8x128xf32, #tpu.memory_space<vmem>>, vector<8x128xf32>
    tpu.vector_store %arg7[%c0_6, %c0_7], %7 {strides = array<i32>} : memref<8x128xf32, #tpu.memory_space<vmem>>, vector<8x128xf32>,
    %c0_i32_8 = arith.constant 0 : i32
    %9 = arith.cmpi eq, %arg2, %c0_i32_8 : i32
    %10 = arith.extui %9 : i1 to i32
    %c0_i32_9 = arith.constant 0 : i32
    %11 = arith.cmpi ne, %10, %c0_i32_9 : i32
    scf.if %11 {
      %c0_10 = arith.constant 0 : index
      %c0_11 = arith.constant 0 : index
      %12 = vector.load %arg7[%c0_10, %c0_11] : memref<8x128xf32, #tpu.memory_space<vmem>>, vector<8x128xf32>
      %c0_12 = arith.constant 0 : index
      %c0_13 = arith.constant 0 : index
      %13 = vector.load %arg5[%c0_12, %c0_13] : memref<1x128xf32, #tpu.memory_space<vmem>>, vector<1x128xf32>
      %14 = vector.broadcast %13 : vector<1x128xf32> to vector<8x128xf32>
      %15 = arith.addf %12, %14 : vector<8x128xf32>
      %c0_14 = arith.constant 0 : index
      %c0_15 = arith.constant 0 : index
      %16 = vector.load %arg6[%c0_14, %c0_15] : memref<8x128xf32, #tpu.memory_space<vmem>>, vector<8x128xf32>
      tpu.vector_store %arg6[%c0_14, %c0_15], %15 {strides = array<i32>} : memref<8x128xf32, #tpu.memory_space<vmem>>, vector<8x128xf32>,
    } else {
    }
    return
  }
  func.func @transform_0(%arg0: i32, %arg1: i32, %arg2: i32) -> (i32, i32) {
    %c0_i32 = arith.constant 0 : i32
    return %arg0, %arg2 : i32, i32
  }
  func.func @transform_1(%arg0: i32, %arg1: i32, %arg2: i32) -> (i32, i32) {
    %c0_i32 = arith.constant 0 : i32
    return %arg2, %arg1 : i32, i32
  }
  func.func @transform_2(%arg0: i32, %arg1: i32, %arg2: i32) -> (i32, i32) {
    %c0_i32 = arith.constant 0 : i32
    %c0_i32_0 = arith.constant 0 : i32
    return %c0_i32, %arg1 : i32, i32
  }
  func.func @transform_3(%arg0: i32, %arg1: i32, %arg2: i32) -> (i32, i32) {
    %c0_i32 = arith.constant 0 : i32
    return %arg0, %arg1 : i32, i32
  }
}

</mosaic_0001>

<bundles_post_ra>
// kernel: linear_classifier.1
= control target key start
LH: loop header
LB: loop body
LE: loop exit
PB: predicated region body
PF: predicated region fallthrough
CT: control target
= control target key end

     0   :  { %v215_v1 = vmov 0.0   ;;  %vm216_vm0 = vmmov 0   ;;  %s295_s0 = inlined_call_operand.vmem [shape: f32[8,128], index: 0, kind: input, shape index: {}]   ;;  %s296_s1 = inlined_call_operand.vmem [shape: f32[128,128], index: 1, kind: input, shape index: {}]   ;;  %s297_s2 = inlined_call_operand.vmem [shape: f32[1,128], index: 2, kind: input, shape index: {}]   ;;  %s298_s3 = inlined_call_operand.hbm [shape: f32[8,128], index: 3, kind: output, shape index: {}]  }
   0x1   :  { %v37_v0 = vld [vmem:[%s296_s1 + $0x78] sm:$0xff]  ;;  %155 = vmatprep.subr.mxu0 %v215_v1  ;;  %v36_v2 = vld [vmem:[%s296_s1 + $0x70] sm:$0xff]  ;;  %187 = vmatprep.mubr.msk.f32.mxu0 %vm216_vm0, %v215_v1  ;;  %v35_v3 = vld [vmem:[%s296_s1 + $0x68] sm:$0xff] }
   0x2   :  { %156 = vmatpush3.msra.mxu0 %v37_v0  ;;  %v34_v4 = vld [vmem:[%s296_s1 + $0x60] sm:$0xff] }
   0x3   :  { %157 = vmatprep.subr.mxu0 %v215_v1 }
   0x4   :  { %158 = vmatpush3.msra.mxu0 %v36_v2 }
   0x5   :  { %159 = vmatprep.subr.mxu0 %v215_v1 }
   0x6   :  { %8 = vsyncpa [#allocation4], 0  ;;  %160 = vmatpush3.msra.mxu0 %v35_v3  ;;  %v33_v5 = vld [vmem:[%s296_s1 + $0x58] sm:$0xff]  ;;  %v32_v6 = vld [vmem:[%s296_s1 + $0x50] sm:$0xff]  ;;  %s217_s21 = smov [#allocation3]  }
   0x7   :  { %161 = vmatprep.subr.mxu0 %v215_v1  ;;  %v31_v7 = vld [vmem:[%s296_s1 + $0x48] sm:$0xff]  ;;  %v30_v8 = vld [vmem:[%s296_s1 + $0x40] sm:$0xff]  ;;  %v29_v9 = vld [vmem:[%s296_s1 + $0x38] sm:$0xff]  ;;  %s129_s22 = sshll.u32 %s217_s21, 4  ;;  %s130_s22 = int_to_ptr.vmem [resolvable:$true] %s129_s22 }
   0x8   :  { %162 = vmatpush3.msra.mxu0 %v34_v4  ;;  %v28_v10 = vld [vmem:[%s296_s1 + $0x30] sm:$0xff]  ;;  %v27_v11 = vld [vmem:[%s296_s1 + $0x28] sm:$0xff]  ;;  %v26_v12 = vld [vmem:[%s296_s1 + $0x20] sm:$0xff]  ;;  %p198_p1 = scmp.lt.s32.totalorder %s130_s22, %s130_s22 }
   0x9   :  { %163 = vmatprep.subr.mxu0 %v215_v1  ;;  %v25_v13 = vld [vmem:[%s296_s1 + $0x18] sm:$0xff]  ;;  %v24_v14 = vld [vmem:[%s296_s1 + $0x10] sm:$0xff]  ;;  %v23_v15 = vld [vmem:[%s296_s1 + $0x8] sm:$0xff] }
   0xa   :  { %164 = vmatpush3.msra.mxu0 %v33_v5  ;;  %v22_v16 = vld [vmem:[%s296_s1] sm:$0xff]  ;;  %s193_s1 = scalar_lea.vmem %s130_s22, 128 }
   0xb   :  { %165 = vmatprep.subr.mxu0 %v215_v1  ;;  %v21_v17 = vld [vmem:[%s295_s0] sm:$0xff]  ;;  %p194_p0 = scmp.ne.s32.totalorder %s130_s22, %s193_s1  ;;  %p199_p2 = scmp.lt.s32.totalorder %s193_s1, %s193_s1 }
   0xc   :  { %166 = vmatpush3.msra.mxu0 %v32_v6  ;;  %v137_v18 = vld [vmem:[%s297_s2] ss:$0 sm:$0xff] }
   0xd   :  { %167 = vmatprep.subr.mxu0 %v215_v1  ;;  %p200_p3 = por %p199_p2, %p198_p1 }
   0xe   :  { %168 = vmatpush3.msra.mxu0 %v31_v7 }
   0xf   :  { %169 = vmatprep.subr.mxu0 %v215_v1  ;;  %p201_p4 = pnand %p200_p3, %p194_p0 }
  0x10   :  { %170 = vmatpush3.msra.mxu0 %v30_v8 }
  0x11   :  { %171 = vmatprep.subr.mxu0 %v215_v1 }
  0x12   :  { %172 = vmatpush3.msra.mxu0 %v29_v9 }
  0x13   :  { %173 = vmatprep.subr.mxu0 %v215_v1 }
  0x14   :  { %174 = vmatpush3.msra.mxu0 %v28_v10 }
  0x15   :  { %175 = vmatprep.subr.mxu0 %v215_v1 }
  0x16   :  { %176 = vmatpush3.msra.mxu0 %v27_v11 }
  0x17   :  { %177 = vmatprep.subr.mxu0 %v215_v1 }
  0x18   :  { %178 = vmatpush3.msra.mxu0 %v26_v12 }
  0x19   :  { %179 = vmatprep.subr.mxu0 %v215_v1 }
  0x1a   :  { %180 = vmatpush3.msra.mxu0 %v25_v13 }
  0x1b   :  { %181 = vmatprep.subr.mxu0 %v215_v1 }
  0x1c   :  { %182 = vmatpush3.msra.mxu0 %v24_v14 }
  0x1d   :  { %183 = vmatprep.subr.mxu0 %v215_v1 }
  0x1e   :  { %184 = vmatpush3.msra.mxu0 %v23_v15 }
  0x1f   :  { %185 = vmatprep.subr.mxu0 %v215_v1 }
  0x20   :  { %186 = vmatpush3.msra.mxu0 %v22_v16 }
  0x21   :  { %188 = vmatmul.mubr.f32.vlgmr.msra.gmra.mxu0 %v21_v17 }
  0xe1   :  { %v104_v19 = vpop.f32.mrf.mxu0 }
  0xe2   :  { %v121_v20 = vadd.f32 %v137_v18, %v104_v19 }
  0xe3   :  { %v189_v21 = vpop.f32.mrf.mxu0 }
  0xe4   :  { %122 = vst [vmem:[#allocation3] sm:$0xff] %v121_v20 }
  0xe5   :  { %204 = shalt.err (!%p201_p4)
}
  0xe6   :  { %132 = dma.vmem_to_hbm [thread:$0]  %s130_s22, 128, %s298_s3, [#allocation4]  }
  0xe7   :  { %213 = dma.done.wait [#allocation4], 128  }
  0xe8   :  { %214 = vsyncadd [#allocation4], 4294967168 }
  0xe9   :  { %136 = vsyncpa [#allocation4], 1 }

</bundles_post_ra>
